<compile_context>
chip_gen: v5e
topology: v5e:2x2
jax: 0.10.0
libtpu: 0.0.40
codegen_flags: <defaults>
</compile_context>

<pallas_src>
import jax
import jax.numpy as jnp
from jax.experimental import pallas as pl
from jax.experimental.pallas import tpu as pltpu

NUM_INPUTS = 4      # CartPole-v0 observation_space.shape[0]
NUM_ACTIONS = 2     # CartPole-v0 action_space.n
HIDDEN = 128
DEFAULT_TILE_B = 1024


def _round_up(n, m):
    return ((n + m - 1) // m) * m


def dqn_kernel(x_ref, w1_ref, b1_ref, w2_ref, b2_ref, w3_ref, b3_ref, q_ref, a_ref):
    # x_ref: (tb, 4) f32          w1: (4, 128) f32     b1: (1, 128) f32
    # w2: (128, 128) f32|bf16     b2: (1, 128) f32
    # w3: (128, 2)  f32|bf16      b3: (1, 2)  f32
    # q_ref: (tb, 2) f32 Q-values      a_ref: (tb, 1) int32 greedy action
    x = x_ref[...]
    w1 = w1_ref[...]

    # Layer 1 on the VPU: contraction dim is only 4, so an MXU pass would be ~97% padding.
    # Compute the 4 broadcast partial products independently and tree-sum them so the
    # VALU work is not one serial dependency chain (v5e/v6e have no f32 FMA).
    parts = [x[:, k:k + 1] * w1[k:k + 1, :] for k in range(NUM_INPUTS)]
    while len(parts) > 1:
        nxt = [parts[i] + parts[i + 1] for i in range(0, len(parts) - 1, 2)]
        if len(parts) % 2:
            nxt.append(parts[-1])
        parts = nxt
    h1 = jnp.maximum(parts[0] + b1_ref[...], 0.0)

    # Layer 2: 128x128 matmul on the MXU; inputs cast to the (possibly bf16) weight dtype,
    # accumulation stays f32.
    h2 = jnp.dot(h1.astype(w2_ref.dtype), w2_ref[...],
                 preferred_element_type=jnp.float32) + b2_ref[...]
    h2 = jnp.maximum(h2, 0.0)

    # Layer 3: narrow (128 -> 2) output; MXU has ample slack for the underfilled N.
    q = jnp.dot(h2.astype(w3_ref.dtype), w3_ref[...],
                preferred_element_type=jnp.float32) + b3_ref[...]
    q_ref[...] = q.astype(q_ref.dtype)

    # Fused greedy action (argmax over the 2 real Q columns; ties -> action 0, matching
    # torch .max(1)[1] / argmax first-max semantics).  Rides on idle VPU slots.
    a_ref[...] = (q[:, 1:2] > q[:, 0:1]).astype(jnp.int32)


def prepare_params(params, use_bf16=True):
    """One-time parameter prep (hoisted out of the forward path).

    Layer-1 weights and all biases stay f32 (VPU path); layer-2/3 MXU weights are
    optionally cast to bf16 (f32 accumulation keeps the Q-values within ~1e-2).
    """
    w1, b1, w2, b2, w3, b3 = params
    mxu_dtype = jnp.bfloat16 if use_bf16 else jnp.float32
    return (w1.astype(jnp.float32), b1.astype(jnp.float32),
            w2.astype(mxu_dtype), b2.astype(jnp.float32),
            w3.astype(mxu_dtype), b3.astype(jnp.float32))


def _dqn_call(x, prepped, tile_b=DEFAULT_TILE_B):
    """x: (B, NUM_INPUTS) f32. Returns (q: (B, NUM_ACTIONS) f32, action: (B,) int32)."""
    w1, b1, w2, b2, w3, b3 = prepped
    B = x.shape[0]

    # Batch tile: large enough to amortize the ~0.35 us per-grid-step overhead, capped so
    # big batches still yield >= 2 grid steps (both v7x TensorCores used); multiple of 8.
    tb = min(tile_b, _round_up(pl.cdiv(B, 2), 8))
    Bp = _round_up(B, tb)
    if Bp != B:
        x = jnp.pad(x, ((0, Bp - B), (0, 0)))
    grid = (Bp // tb,)

    def resident(a):
        shape = a.shape
        # Constant block index across the grid -> fetched once, stays VMEM-resident.
        return pl.BlockSpec(shape, lambda i: (0,) * len(shape))

    q, act = pl.pallas_call(
        dqn_kernel,
        out_shape=(jax.ShapeDtypeStruct((Bp, NUM_ACTIONS), jnp.float32),
                   jax.ShapeDtypeStruct((Bp, 1), jnp.int32)),
        grid_spec=pltpu.PrefetchScalarGridSpec(
            num_scalar_prefetch=0,
            grid=grid,
            in_specs=[
                pl.BlockSpec((tb, NUM_INPUTS), lambda i: (i, 0)),  # streamed batch tiles
                resident(w1),
                resident(b1),
                resident(w2),
                resident(b2),
                resident(w3),
                resident(b3),
            ],
            out_specs=[
                pl.BlockSpec((tb, NUM_ACTIONS), lambda i: (i, 0)),
                pl.BlockSpec((tb, 1), lambda i: (i, 0)),
            ],
        ),
        compiler_params=pltpu.CompilerParams(
            dimension_semantics=("parallel",),   # batch tiles shard across TCs on v7x
        ),
    )(x, w1, b1, w2, b2, w3, b3)

    return q[:B], act[:B, 0]


def dqn_forward(x, prepped, tile_b=DEFAULT_TILE_B):
    """Forward pass: (B, NUM_INPUTS) -> (B, NUM_ACTIONS) Q-values."""
    return _dqn_call(x, prepped, tile_b)[0]


def dqn_act(state, prepped):
    """Greedy action (epsilon = 0 path of DQN.act), using the in-kernel fused argmax."""
    # TODO(synk): the epsilon-greedy random branch (python `random`) and the gym env loop
    # are host-side control flow with no Pallas equivalent; only the greedy path is here.
    x = state[None, :] if state.ndim == 1 else state
    return _dqn_call(x, prepped)[1]


def init_params(key):
    """Deterministic init mirroring nn.Linear default (uniform +/- 1/sqrt(fan_in)).

    Weights are stored as (in_features, out_features) — the transpose of PyTorch's
    (out, in) layout — so the kernel computes x @ W + b directly.
    """
    ks = jax.random.split(key, 6)

    def linear(kw, kb, fan_in, fan_out):
        bound = 1.0 / jnp.sqrt(jnp.float32(fan_in))
        w = jax.random.uniform(kw, (fan_in, fan_out), jnp.float32, -bound, bound)
        b = jax.random.uniform(kb, (1, fan_out), jnp.float32, -bound, bound)
        return w, b

    w1, b1 = linear(ks[0], ks[1], NUM_INPUTS, HIDDEN)
    w2, b2 = linear(ks[2], ks[3], HIDDEN, HIDDEN)
    w3, b3 = linear(ks[4], ks[5], HIDDEN, NUM_ACTIONS)
    return (w1, b1, w2, b2, w3, b3)


def dqn_reference(x, params):
    w1, b1, w2, b2, w3, b3 = params
    h1 = jnp.maximum(x @ w1 + b1, 0.0)
    h2 = jnp.maximum(h1 @ w2 + b2, 0.0)
    return h2 @ w3 + b3


if __name__ == "__main__":
    key = jax.random.PRNGKey(0)
    k_params, k_x1, k_x2 = jax.random.split(key, 3)

    params = init_params(k_params)
    ref_small_fn = lambda xx: dqn_reference(xx, params)

    # ---- exact f32 path -------------------------------------------------------------
    prepped_f32 = prepare_params(params, use_bf16=False)

    # Small act()-sized batch of CartPole states (dim 4).
    x_small = jax.random.normal(k_x1, (8, NUM_INPUTS), jnp.float32)
    q_small, act_small = _dqn_call(x_small, prepped_f32)
    q_small = jax.block_until_ready(q_small)
    assert q_small.shape == (8, NUM_ACTIONS)
    assert jnp.allclose(q_small, ref_small_fn(x_small), atol=1e-5, rtol=1e-5)
    # fused argmax must be consistent with the kernel's own Q output
    assert act_small.shape == (8,)
    assert bool(jnp.all(act_small == jnp.argmax(q_small, axis=-1)))

    # Larger, non-multiple-of-tile batch exercises the batch grid + padding path
    # (and the >=2-grid-step megacore cap).
    x_big = jax.random.normal(k_x2, (300, NUM_INPUTS), jnp.float32)
    q_big = jax.block_until_ready(dqn_forward(x_big, prepped_f32))
    assert q_big.shape == (300, NUM_ACTIONS)
    assert jnp.allclose(q_big, dqn_reference(x_big, params), atol=1e-4, rtol=1e-4)

    # ---- bf16-MXU path (v6e/v7x fast path; f32 accumulation) -------------------------
    prepped_bf16 = prepare_params(params, use_bf16=True)
    q_bf16 = jax.block_until_ready(dqn_forward(x_big, prepped_bf16))
    assert q_bf16.shape == (300, NUM_ACTIONS)
    assert jnp.allclose(q_bf16, dqn_reference(x_big, params), atol=5e-2, rtol=5e-2)

    # Greedy action as in DQN.act (epsilon = 0 path), single CartPole state.
    a0 = jax.block_until_ready(dqn_act(x_small[0], prepped_f32))
    assert a0.shape == (1,)

    print("KERNEL_OK")
</pallas_src>

<mosaic_0001>
module attributes {stable_mosaic.version = 11 : i64} {
  func.func @dqn_kernel(%arg0: i32, %arg1: memref<8x4xf32, #tpu.memory_space<vmem>>, %arg2: memref<4x128xf32, #tpu.memory_space<vmem>>, %arg3: memref<1x128xf32, #tpu.memory_space<vmem>>, %arg4: memref<128x128xf32, #tpu.memory_space<vmem>>, %arg5: memref<1x128xf32, #tpu.memory_space<vmem>>, %arg6: memref<128x2xf32, #tpu.memory_space<vmem>>, %arg7: memref<1x2xf32, #tpu.memory_space<vmem>>, %arg8: memref<8x2xf32, #tpu.memory_space<vmem>>, %arg9: memref<8x1xi32, #tpu.memory_space<vmem>>) attributes {dimension_semantics = [#tpu.dimension_semantics<parallel>], iteration_bounds = array<i64: 1>, scalar_prefetch = 0 : i64, scratch_operands = 0 : i64, tpu.core_type = #tpu.core_type<tc>, window_params = [{transform_indices = @transform_0, window_bounds = array<i64: 8, 4>}, {pipeline_mode = #tpu.pipeline_mode<synchronous>, transform_indices = @transform_1, window_bounds = array<i64: 4, 128>}, {pipeline_mode = #tpu.pipeline_mode<synchronous>, transform_indices = @transform_2, window_bounds = array<i64: 1, 128>}, {pipeline_mode = #tpu.pipeline_mode<synchronous>, transform_indices = @transform_3, window_bounds = array<i64: 128, 128>}, {pipeline_mode = #tpu.pipeline_mode<synchronous>, transform_indices = @transform_4, window_bounds = array<i64: 1, 128>}, {pipeline_mode = #tpu.pipeline_mode<synchronous>, transform_indices = @transform_5, window_bounds = array<i64: 128, 2>}, {pipeline_mode = #tpu.pipeline_mode<synchronous>, transform_indices = @transform_6, window_bounds = array<i64: 1, 2>}, {transform_indices = @transform_7, window_bounds = array<i64: 8, 2>}, {transform_indices = @transform_8, window_bounds = array<i64: 8, 1>}]} {
    %c0 = arith.constant 0 : index
    %c0_0 = arith.constant 0 : index
    %0 = vector.load %arg1[%c0, %c0_0] : memref<8x4xf32, #tpu.memory_space<vmem>>, vector<8x4xf32>
    %c0_1 = arith.constant 0 : index
    %c0_2 = arith.constant 0 : index
    %1 = vector.load %arg2[%c0_1, %c0_2] : memref<4x128xf32, #tpu.memory_space<vmem>>, vector<4x128xf32>
    %2 = vector.extract_strided_slice %0 {offsets = [0, 0], sizes = [8, 1], strides = [1, 1]} : vector<8x4xf32> to vector<8x1xf32>
    %3 = vector.extract_strided_slice %1 {offsets = [0, 0], sizes = [1, 128], strides = [1, 1]} : vector<4x128xf32> to vector<1x128xf32>
    %4 = vector.broadcast %2 : vector<8x1xf32> to vector<8x128xf32>
    %5 = vector.broadcast %3 : vector<1x128xf32> to vector<8x128xf32>
    %6 = arith.mulf %4, %5 : vector<8x128xf32>
    %7 = vector.extract_strided_slice %0 {offsets = [0, 1], sizes = [8, 1], strides = [1, 1]} : vector<8x4xf32> to vector<8x1xf32>
    %8 = vector.extract_strided_slice %1 {offsets = [1, 0], sizes = [1, 128], strides = [1, 1]} : vector<4x128xf32> to vector<1x128xf32>
    %9 = vector.broadcast %7 : vector<8x1xf32> to vector<8x128xf32>
    %10 = vector.broadcast %8 : vector<1x128xf32> to vector<8x128xf32>
    %11 = arith.mulf %9, %10 : vector<8x128xf32>
    %12 = vector.extract_strided_slice %0 {offsets = [0, 2], sizes = [8, 1], strides = [1, 1]} : vector<8x4xf32> to vector<8x1xf32>
    %13 = vector.extract_strided_slice %1 {offsets = [2, 0], sizes = [1, 128], strides = [1, 1]} : vector<4x128xf32> to vector<1x128xf32>
    %14 = vector.broadcast %12 : vector<8x1xf32> to vector<8x128xf32>
    %15 = vector.broadcast %13 : vector<1x128xf32> to vector<8x128xf32>
    %16 = arith.mulf %14, %15 : vector<8x128xf32>
    %17 = vector.extract_strided_slice %0 {offsets = [0, 3], sizes = [8, 1], strides = [1, 1]} : vector<8x4xf32> to vector<8x1xf32>
    %18 = vector.extract_strided_slice %1 {offsets = [3, 0], sizes = [1, 128], strides = [1, 1]} : vector<4x128xf32> to vector<1x128xf32>
    %19 = vector.broadcast %17 : vector<8x1xf32> to vector<8x128xf32>
    %20 = vector.broadcast %18 : vector<1x128xf32> to vector<8x128xf32>
    %21 = arith.mulf %19, %20 : vector<8x128xf32>
    %22 = arith.addf %6, %11 : vector<8x128xf32>
    %23 = arith.addf %16, %21 : vector<8x128xf32>
    %24 = arith.addf %22, %23 : vector<8x128xf32>
    %c0_3 = arith.constant 0 : index
    %c0_4 = arith.constant 0 : index
    %25 = vector.load %arg3[%c0_3, %c0_4] : memref<1x128xf32, #tpu.memory_space<vmem>>, vector<1x128xf32>
    %26 = vector.broadcast %25 : vector<1x128xf32> to vector<8x128xf32>
    %27 = arith.addf %24, %26 : vector<8x128xf32>
    %cst = arith.constant 0.000000e+00 : f32
    %28 = vector.broadcast %cst : f32 to vector<8x128xf32>
    %29 = arith.maximumf %27, %28 : vector<8x128xf32>
    %c0_5 = arith.constant 0 : index
    %c0_6 = arith.constant 0 : index
    %30 = vector.load %arg4[%c0_5, %c0_6] : memref<128x128xf32, #tpu.memory_space<vmem>>, vector<128x128xf32>
    %cst_7 = arith.constant dense<0.000000e+00> : vector<8x128xf32>
    %31 = tpu.matmul %29, %30, %cst_7 {dimension_numbers = #tpu.dot_dimension_numbers<[1], [0], [0], [1], [0, 0, 1, 1], [], []>} : vector<8x128xf32>, vector<128x128xf32>, vector<8x128xf32> -> vector<8x128xf32>
    %c0_8 = arith.constant 0 : index
    %c0_9 = arith.constant 0 : index
    %32 = vector.load %arg5[%c0_8, %c0_9] : memref<1x128xf32, #tpu.memory_space<vmem>>, vector<1x128xf32>
    %33 = vector.broadcast %32 : vector<1x128xf32> to vector<8x128xf32>
    %34 = arith.addf %31, %33 : vector<8x128xf32>
    %cst_10 = arith.constant 0.000000e+00 : f32
    %35 = vector.broadcast %cst_10 : f32 to vector<8x128xf32>
    %36 = arith.maximumf %34, %35 : vector<8x128xf32>
    %c0_11 = arith.constant 0 : index
    %c0_12 = arith.constant 0 : index
    %37 = vector.load %arg6[%c0_11, %c0_12] : memref<128x2xf32, #tpu.memory_space<vmem>>, vector<128x2xf32>
    %cst_13 = arith.constant dense<0.000000e+00> : vector<8x2xf32>
    %38 = tpu.matmul %36, %37, %cst_13 {dimension_numbers = #tpu.dot_dimension_numbers<[1], [0], [0], [1], [0, 0, 1, 1], [], []>} : vector<8x128xf32>, vector<128x2xf32>, vector<8x2xf32> -> vector<8x2xf32>
    %c0_14 = arith.constant 0 : index
    %c0_15 = arith.constant 0 : index
    %39 = vector.load %arg7[%c0_14, %c0_15] : memref<1x2xf32, #tpu.memory_space<vmem>>, vector<1x2xf32>
    %40 = vector.broadcast %39 : vector<1x2xf32> to vector<8x2xf32>
    %41 = arith.addf %38, %40 : vector<8x2xf32>
    %c0_16 = arith.constant 0 : index
    %c0_17 = arith.constant 0 : index
    %42 = vector.load %arg8[%c0_16, %c0_17] : memref<8x2xf32, #tpu.memory_space<vmem>>, vector<8x2xf32>
    tpu.vector_store %arg8[%c0_16, %c0_17], %41 {strides = array<i32>} : memref<8x2xf32, #tpu.memory_space<vmem>>, vector<8x2xf32>,
    %43 = vector.extract_strided_slice %41 {offsets = [0, 1], sizes = [8, 1], strides = [1, 1]} : vector<8x2xf32> to vector<8x1xf32>
    %44 = vector.extract_strided_slice %41 {offsets = [0, 0], sizes = [8, 1], strides = [1, 1]} : vector<8x2xf32> to vector<8x1xf32>
    %45 = arith.cmpf ogt, %43, %44 : vector<8x1xf32>
    %46 = arith.extui %45 : vector<8x1xi1> to vector<8x1xi32>
    %c0_18 = arith.constant 0 : index
    %c0_19 = arith.constant 0 : index
    %47 = vector.load %arg9[%c0_18, %c0_19] : memref<8x1xi32, #tpu.memory_space<vmem>>, vector<8x1xi32>
    tpu.vector_store %arg9[%c0_18, %c0_19], %46 {strides = array<i32>} : memref<8x1xi32, #tpu.memory_space<vmem>>, vector<8x1xi32>,
    return
  }
  func.func @transform_0(%arg0: i32) -> (i32, i32) {
    %c0_i32 = arith.constant 0 : i32
    %c0_i32_0 = arith.constant 0 : i32
    return %arg0, %c0_i32 : i32, i32
  }
  func.func @transform_1(%arg0: i32) -> (i32, i32) {
    %c0_i32 = arith.constant 0 : i32
    %c0_i32_0 = arith.constant 0 : i32
    %c0_i32_1 = arith.constant 0 : i32
    return %c0_i32, %c0_i32_0 : i32, i32
  }
  func.func @transform_2(%arg0: i32) -> (i32, i32) {
    %c0_i32 = arith.constant 0 : i32
    %c0_i32_0 = arith.constant 0 : i32
    %c0_i32_1 = arith.constant 0 : i32
    return %c0_i32, %c0_i32_0 : i32, i32
  }
  func.func @transform_3(%arg0: i32) -> (i32, i32) {
    %c0_i32 = arith.constant 0 : i32
    %c0_i32_0 = arith.constant 0 : i32
    %c0_i32_1 = arith.constant 0 : i32
    return %c0_i32, %c0_i32_0 : i32, i32
  }
  func.func @transform_4(%arg0: i32) -> (i32, i32) {
    %c0_i32 = arith.constant 0 : i32
    %c0_i32_0 = arith.constant 0 : i32
    %c0_i32_1 = arith.constant 0 : i32
    return %c0_i32, %c0_i32_0 : i32, i32
  }
  func.func @transform_5(%arg0: i32) -> (i32, i32) {
    %c0_i32 = arith.constant 0 : i32
    %c0_i32_0 = arith.constant 0 : i32
    %c0_i32_1 = arith.constant 0 : i32
    return %c0_i32, %c0_i32_0 : i32, i32
  }
  func.func @transform_6(%arg0: i32) -> (i32, i32) {
    %c0_i32 = arith.constant 0 : i32
    %c0_i32_0 = arith.constant 0 : i32
    %c0_i32_1 = arith.constant 0 : i32
    return %c0_i32, %c0_i32_0 : i32, i32
  }
  func.func @transform_7(%arg0: i32) -> (i32, i32) {
    %c0_i32 = arith.constant 0 : i32
    %c0_i32_0 = arith.constant 0 : i32
    return %arg0, %c0_i32 : i32, i32
  }
  func.func @transform_8(%arg0: i32) -> (i32, i32) {
    %c0_i32 = arith.constant 0 : i32
    %c0_i32_0 = arith.constant 0 : i32
    return %arg0, %c0_i32 : i32, i32
  }
}

</mosaic_0001>

<bundles_post_ra>
// kernel: tpu_custom_call.1
= control target key start
LH: loop header
LB: loop body
LE: loop exit
PB: predicated region body
PF: predicated region fallthrough
CT: control target
= control target key end

     0   :  { %v179_v0 = vmov 2   ;;  %v180_v1 = vmov 0   ;;  %v181_v8 = vmov 3   ;;  %v182_v9 = vmov 1   ;;  %s349_s0 = inlined_call_operand.vmem [shape: f32[8,4], index: 0, kind: input, shape index: {}]   ;;  %s350_s3 = inlined_call_operand.vmem [shape: f32[128,128], index: 3, kind: input, shape index: {}]   ;;  %s351_s2 = inlined_call_operand.vmem [shape: f32[1,128], index: 2, kind: input, shape index: {}]   ;;  %s352_s4 = inlined_call_operand.vmem [shape: f32[1,128], index: 4, kind: input, shape index: {}]   ;;  %s353_s5 = inlined_call_operand.vmem [shape: f32[128,2], index: 5, kind: input, shape index: {}]   ;;  %s354_s1 = inlined_call_operand.vmem [shape: f32[4,128], index: 1, kind: input, shape index: {}]   ;;  %s355_s6 = inlined_call_operand.vmem [shape: f32[1,2], index: 6, kind: input, shape index: {}]   ;;  %s356_s7 = inlined_call_operand.vmem [shape: f32[8,2], index: 7, kind: output, shape index: {0}]   ;;  %s357_s8 = inlined_call_operand.vmem [shape: s32[8,1], index: 8, kind: output, shape index: {1}]  }
   0x1   :  { %173 = vset.pattern.permute.xlu1 %v179_v0  ;;  %171 = vset.pattern.permute.xlu0 %v180_v1  ;;  %v28_v2 = vld [vmem:[%s349_s0] sm:$0xff]  ;;  %v79_v3 = vld [vmem:[%s350_s3 + $0x78] sm:$0xff]  ;;  %v78_v4 = vld [vmem:[%s350_s3 + $0x70] sm:$0xff]  ;;  %vm145_vm0 = vcmask 15360   ;;  %vm155_vm2 = vcmask 7168  }
   0x2   :  { %44 = vperm.xlu1 %173, %v28_v2   ;;  %32 = vperm.xlu0 %171, %v28_v2   ;;  %v77_v5 = vld [vmem:[%s350_s3 + $0x68] sm:$0xff]  ;;  %v76_v6 = vld [vmem:[%s350_s3 + $0x60] sm:$0xff]  ;;  %v75_v7 = vld [vmem:[%s350_s3 + $0x58] sm:$0xff] }
   0x3   :  { %84 = vmatpush.msra.mxu0 %v79_v3  ;;  %v74_v10 = vld [vmem:[%s350_s3 + $0x50] sm:$0xff]  ;;  %v73_v11 = vld [vmem:[%s350_s3 + $0x48] sm:$0xff]  ;;  %v72_v12 = vld [vmem:[%s350_s3 + $0x40] sm:$0xff] }
   0x4   :  { %v71_v13 = vld [vmem:[%s350_s3 + $0x38] sm:$0xff]  ;;  %v70_v14 = vld [vmem:[%s350_s3 + $0x30] sm:$0xff]  ;;  %v69_v15 = vld [vmem:[%s350_s3 + $0x28] sm:$0xff] }
   0x5   :  { %85 = vmatpush.msra.mxu0 %v78_v4  ;;  %v68_v16 = vld [vmem:[%s350_s3 + $0x20] sm:$0xff]  ;;  %v67_v17 = vld [vmem:[%s350_s3 + $0x18] sm:$0xff]  ;;  %v66_v18 = vld [vmem:[%s350_s3 + $0x10] sm:$0xff] }
   0x6   :  { %v65_v19 = vld [vmem:[%s350_s3 + $0x8] sm:$0xff]  ;;  %v64_v20 = vld [vmem:[%s350_s3] sm:$0xff]  ;;  %v120_v21 = vld [vmem:[%s353_s5 + $0x78] sm:$0xff] }
   0x7   :  { %86 = vmatpush.msra.mxu0 %v77_v5  ;;  %v119_v22 = vld [vmem:[%s353_s5 + $0x70] sm:$0xff]  ;;  %125 = vmatpush.msra.mxu1 %v120_v21  ;;  %v118_v23 = vld [vmem:[%s353_s5 + $0x68] sm:$0xff]  ;;  %v117_v24 = vld [vmem:[%s353_s5 + $0x60] sm:$0xff] }
   0x8   :  { %v116_v25 = vld [vmem:[%s353_s5 + $0x58] sm:$0xff]  ;;  %v115_v26 = vld [vmem:[%s353_s5 + $0x50] sm:$0xff]  ;;  %v114_v27 = vld [vmem:[%s353_s5 + $0x48] sm:$0xff] }
   0x9   :  { %87 = vmatpush.msra.mxu0 %v76_v6  ;;  %126 = vmatpush.msra.mxu1 %v119_v22  ;;  %v113_v30 = vld [vmem:[%s353_s5 + $0x40] sm:$0xff]  ;;  %v112_v31 = vld [vmem:[%s353_s5 + $0x38] sm:$0xff]  ;;  %v111_v33 = vld [vmem:[%s353_s5 + $0x30] sm:$0xff] }
   0xa   :  { %174 = vset.pattern.permute.xlu1 %v181_v8  ;;  %172 = vset.pattern.permute.xlu0 %v182_v9  ;;  %v29_v32 = vld [vmem:[%s354_s1] sm:$0xf]  ;;  %v110_v38 = vld [vmem:[%s353_s5 + $0x28] sm:$0xff]  ;;  %v108_v46 = vld [vmem:[%s353_s5 + $0x18] sm:$0xff] }
   0xb   :  { %50 = vperm.xlu1 %174, %v28_v2   ;;  %38 = vperm.xlu0 %172, %v28_v2   ;;  %v47_v34 = vperm.slane %v29_v32, 2  ;;  %v35_v35 = vperm.slane %v29_v32, 0  ;;  %v53_v36 = vperm.slane %v29_v32, 3  ;;  %v41_v37 = vperm.slane %v29_v32, 1  ;;  %v109_v39 = vld [vmem:[%s353_s5 + $0x20] sm:$0xff]  ;;  %v107_v53 = vld [vmem:[%s353_s5 + $0x10] sm:$0xff] }
   0xc   :  { %88 = vmatpush.msra.mxu0 %v75_v7  ;;  %127 = vmatpush.msra.mxu1 %v118_v23  ;;  %v176_v49 = vld [vmem:[%s351_s2] ss:$0 sm:$0xff]  ;;  %v106_v54 = vld [vmem:[%s353_s5 + $0x8] sm:$0xff] }
   0xd   :  { %v105_v55 = vld [vmem:[%s353_s5] sm:$0xff]  ;;  %s183_s5 = smov 1  }
   0xe   :  { %89 = vmatpush.msra.mxu0 %v74_v10  ;;  %128 = vmatpush.msra.mxu1 %v117_v24  ;;  %v177_v56 = vld [vmem:[%s352_s4] ss:$0 sm:$0xff]  ;;  %s184_s4 = smov 127  }
   0xf   :  { %v178_v60 = vld [vmem:[%s355_s6] ss:$0 sm:$0xff] }
  0x10   :  { %90 = vmatpush.msra.mxu0 %v73_v11  ;;  %129 = vmatpush.msra.mxu1 %v116_v25 }
  0x12   :  { %91 = vmatpush.msra.mxu0 %v72_v12  ;;  %130 = vmatpush.msra.mxu1 %v115_v26 }
  0x13   :  { %175 = vset.pattern.permute.xlu0 %v181_v8 }
  0x14   :  { %92 = vmatpush.msra.mxu0 %v71_v13  ;;  %131 = vmatpush.msra.mxu1 %v114_v27 }
  0x16   :  { %93 = vmatpush.msra.mxu0 %v70_v14  ;;  %132 = vmatpush.msra.mxu1 %v113_v30 }
  0x18   :  { %94 = vmatpush.msra.mxu0 %v69_v15  ;;  %133 = vmatpush.msra.mxu1 %v112_v31 }
  0x1a   :  { %95 = vmatpush.msra.mxu0 %v68_v16  ;;  %134 = vmatpush.msra.mxu1 %v111_v33 }
  0x1c   :  { %96 = vmatpush.msra.mxu0 %v67_v17  ;;  %135 = vmatpush.msra.mxu1 %v110_v38 }
  0x1e   :  { %97 = vmatpush.msra.mxu0 %v66_v18  ;;  %136 = vmatpush.msra.mxu1 %v109_v39 }
  0x20   :  { %98 = vmatpush.msra.mxu0 %v65_v19  ;;  %137 = vmatpush.msra.mxu1 %v108_v46 }
  0x22   :  { %99 = vmatpush.msra.mxu0 %v64_v20  ;;  %138 = vmatpush.msra.mxu1 %v107_v53 }
  0x24   :  { %139 = vmatpush.msra.mxu1 %v106_v54 }
  0x26   :  { %140 = vmatpush.msra.mxu1 %v105_v55 }
  0x74   :  { %v45_v28 = vpop.permute.xlu1 %44  ;;  %v33_v29 = vpop.permute.xlu0 %32 }
  0x75   :  { %v48_v42 = vmul.f32 %v47_v34, %v45_v28  ;;  %v36_v43 = vmul.f32 %v35_v35, %v33_v29 }
  0x7d   :  { %v51_v40 = vpop.permute.xlu1 %50  ;;  %v39_v41 = vpop.permute.xlu0 %38 }
  0x7e   :  { %v54_v44 = vmul.f32 %v53_v36, %v51_v40  ;;  %v42_v45 = vmul.f32 %v41_v37, %v39_v41 }
  0x80   :  { %v56_v47 = vadd.f32 %v54_v44, %v48_v42  ;;  %v55_v48 = vadd.f32 %v42_v45, %v36_v43 }
  0x82   :  { %v57_v50 = vadd.f32 %v56_v47, %v55_v48 }
  0x84   :  { %v62_v51 = vadd.f32 %v176_v49, %v57_v50 }
  0x86   :  { %v63_v52 = vmax.f32 %v62_v51, 0.0 }
  0x88   :  { %100 = vmatmul.f32.vlgmr.msra.gmra.mxu0 %v63_v52 }
 0x105   :  { %v101_v57 = vpop.f32.mrf.mxu0 }
 0x106   :  { %v102_v58 = vadd.f32 %v177_v56, %v101_v57 }
 0x108   :  { %v104_v59 = vmax.f32 %v102_v58, 0.0 }
 0x10a   :  { %141 = vmatmul.f32.vlgmr.msra.gmra.mxu1 %v104_v59 }
 0x187   :  { %v142_v61 = vpop.f32.mrf.mxu1 }
 0x188   :  { %v143_v62 = vadd.f32 %v178_v60, %v142_v61 }
 0x18a   :  { %146 = vst.msk [vmem:[%s356_s7] sm:$0xff] %vm145_vm0, %v143_v62  ;;  %148 = vrot.lane.b32.xlu2 %v143_v62, %s183_s5 }
 0x1e4   :  { %v149_v63 = vpop.permute.xlu2 %148 }
 0x1e5   :  { %vm151_vm1 = vcmp.gt.f32.partialorder %v143_v62, %v149_v63 }
 0x1e6   :  { %v152_v0 = vsel %vm151_vm1, 1, %v180_v1 }
 0x1e7   :  { %153 = vrot.lane.b32.xlu2 %v152_v0, %s184_s4 }
 0x241   :  { %v154_v2 = vpop.permute.xlu2 %153 }
 0x242   :  { %156 = vst.msk [vmem:[%s357_s8] sm:$0xff] %vm155_vm2, %v154_v2 }

</bundles_post_ra>
